<compile_context>
chip_gen: v7x
topology: tpu7x:2x2x1
jax: 0.10.0
libtpu: 0.0.40
codegen_flags: <defaults>
</compile_context>

<pallas_src>
import jax
import jax.numpy as jnp
from jax.experimental import pallas as pl
from jax.experimental.pallas import tpu as pltpu


K_IN = 784          # logical input features (28*28)
K_PAD = 896         # 7 * 128 lane-aligned K
H1 = 256
H2 = 64
N_OUT_PAD = 128     # fc3 output padded to one full lane group


def _discriminator_kernel(x_ref, w1_ref, b1_ref, w2_ref, b2_ref,
                          w3_ref, b3_ref, o_ref):
    x = x_ref[...]                                                        # (TM, 896) bf16

    # fc1 + relu  (bf16 MXU inputs, f32 accumulation; bias/relu in f32 on VPU)
    h1 = jnp.dot(x, w1_ref[...], preferred_element_type=jnp.float32)     # (TM, 256)
    h1 = jnp.maximum(h1 + b1_ref[...], 0.0)

    # fc2 + relu
    h2 = jnp.dot(h1.astype(jnp.bfloat16), w2_ref[...],
                 preferred_element_type=jnp.float32)                     # (TM, 64)
    h2 = jnp.maximum(h2 + b2_ref[...], 0.0)

    # fc3 (padded to 128 output lanes so the store is lane-dense) + sigmoid
    logit = jnp.dot(h2.astype(jnp.bfloat16), w3_ref[...],
                    preferred_element_type=jnp.float32)                  # (TM, 128)
    logit = logit + b3_ref[...]
    # sigmoid = 1 / (1 + exp(-x)); exp + approx reciprocal both land on the EUP.
    o_ref[...] = pl.reciprocal(1.0 + jnp.exp(-logit), approx=True)


def _round_up(n, m):
    return ((n + m - 1) // m) * m


def discriminator_forward(x, params, tm=256):
    """x: any shape whose total size is divisible by 784 (torch: x.view(-1, 784)).
    Returns (B, 1) float32 probabilities, B = x.size // 784."""
    w1, b1, w2, b2, w3, b3 = params
    x2d = x.reshape(-1, K_IN).astype(jnp.float32)
    B = x2d.shape[0]

    # Batch tile: multiple of 8 sublanes; don't over-pad tiny batches.
    tm = min(tm, _round_up(B, 8))
    b_pad = _round_up(B, tm)

    # Zero-pad batch tail and the K dim (784 -> 896); cast MXU inputs to bf16.
    xp = jnp.zeros((b_pad, K_PAD), jnp.bfloat16)
    xp = xp.at[:B, :K_IN].set(x2d.astype(jnp.bfloat16))

    w1p = jnp.zeros((K_PAD, H1), jnp.bfloat16).at[:K_IN, :].set(w1.astype(jnp.bfloat16))
    w2b = w2.astype(jnp.bfloat16)
    w3p = jnp.zeros((H2, N_OUT_PAD), jnp.bfloat16).at[:, :1].set(w3.astype(jnp.bfloat16))
    b3p = jnp.zeros((1, N_OUT_PAD), jnp.float32).at[:, :1].set(b3.astype(jnp.float32))

    grid = (b_pad // tm,)
    out = pl.pallas_call(
        _discriminator_kernel,
        out_shape=jax.ShapeDtypeStruct((b_pad, N_OUT_PAD), jnp.float32),
        grid=grid,
        in_specs=[
            pl.BlockSpec((tm, K_PAD), lambda i: (i, 0)),        # x tile
            pl.BlockSpec((K_PAD, H1), lambda i: (0, 0)),        # w1 (resident)
            pl.BlockSpec((1, H1), lambda i: (0, 0)),            # b1
            pl.BlockSpec((H1, H2), lambda i: (0, 0)),           # w2
            pl.BlockSpec((1, H2), lambda i: (0, 0)),            # b2
            pl.BlockSpec((H2, N_OUT_PAD), lambda i: (0, 0)),    # w3 (padded)
            pl.BlockSpec((1, N_OUT_PAD), lambda i: (0, 0)),     # b3 (padded)
        ],
        out_specs=pl.BlockSpec((tm, N_OUT_PAD), lambda i: (i, 0)),
        compiler_params=pltpu.CompilerParams(
            dimension_semantics=("parallel",)),
    )(xp, w1p, b1.astype(jnp.float32), w2b, b2.astype(jnp.float32), w3p, b3p)

    return out[:B, :1]


def init_params(key):
    """Deterministic init mirroring torch.nn.Linear defaults:
    U(-1/sqrt(fan_in), 1/sqrt(fan_in)) for both weight and bias.
    Weights stored as (in_features, out_features)."""
    dims = [(K_IN, H1), (H1, H2), (H2, 1)]
    params = []
    for fan_in, fan_out in dims:
        key, kw, kb = jax.random.split(key, 3)
        bound = 1.0 / jnp.sqrt(jnp.float32(fan_in))
        w = jax.random.uniform(kw, (fan_in, fan_out), jnp.float32, -bound, bound)
        b = jax.random.uniform(kb, (1, fan_out), jnp.float32, -bound, bound)
        params += [w, b]
    return tuple(params)


def _reference_forward(x, params):
    """Pure-JAX f32 reference for sanity checking."""
    w1, b1, w2, b2, w3, b3 = params
    h = x.reshape(-1, K_IN).astype(jnp.float32)
    h = jnp.maximum(h @ w1 + b1, 0.0)
    h = jnp.maximum(h @ w2 + b2, 0.0)
    return jax.nn.sigmoid(h @ w3 + b3)


if __name__ == "__main__":
    key = jax.random.PRNGKey(0)
    kp, kx = jax.random.split(key)
    params = init_params(kp)

    # MNIST-like input: (batch=8, channels=1, 28, 28) -> view(-1, 784)
    x = jax.random.normal(kx, (8, 1, 28, 28), jnp.float32)

    out = discriminator_forward(x, params)
    out = jax.block_until_ready(out)

    ref = _reference_forward(x, params)
    assert out.shape == (8, 1), out.shape
    # bf16 matmul inputs + approx reciprocal -> looser tolerance vs f32 reference.
    assert jnp.allclose(out, ref, atol=2e-2, rtol=2e-2), "mismatch vs reference"

    print("KERNEL_OK")
</pallas_src>

<mosaic_0001>
module attributes {stable_mosaic.version = 11 : i64} {
  func.func @_discriminator_kernel(%arg0: i32, %arg1: memref<8x896xbf16, #tpu.memory_space<vmem>>, %arg2: memref<896x256xbf16, #tpu.memory_space<vmem>>, %arg3: memref<1x256xf32, #tpu.memory_space<vmem>>, %arg4: memref<256x64xbf16, #tpu.memory_space<vmem>>, %arg5: memref<1x64xf32, #tpu.memory_space<vmem>>, %arg6: memref<64x128xbf16, #tpu.memory_space<vmem>>, %arg7: memref<1x128xf32, #tpu.memory_space<vmem>>, %arg8: memref<8x128xf32, #tpu.memory_space<vmem>>) attributes {dimension_semantics = [#tpu.dimension_semantics<parallel>], iteration_bounds = array<i64: 1>, scalar_prefetch = 0 : i64, scratch_operands = 0 : i64, tpu.core_type = #tpu.core_type<tc>, window_params = [{transform_indices = @transform_0, window_bounds = array<i64: 8, 896>}, {pipeline_mode = #tpu.pipeline_mode<synchronous>, transform_indices = @transform_1, window_bounds = array<i64: 896, 256>}, {pipeline_mode = #tpu.pipeline_mode<synchronous>, transform_indices = @transform_2, window_bounds = array<i64: 1, 256>}, {pipeline_mode = #tpu.pipeline_mode<synchronous>, transform_indices = @transform_3, window_bounds = array<i64: 256, 64>}, {pipeline_mode = #tpu.pipeline_mode<synchronous>, transform_indices = @transform_4, window_bounds = array<i64: 1, 64>}, {pipeline_mode = #tpu.pipeline_mode<synchronous>, transform_indices = @transform_5, window_bounds = array<i64: 64, 128>}, {pipeline_mode = #tpu.pipeline_mode<synchronous>, transform_indices = @transform_6, window_bounds = array<i64: 1, 128>}, {transform_indices = @transform_7, window_bounds = array<i64: 8, 128>}]} {
    %c0 = arith.constant 0 : index
    %c0_0 = arith.constant 0 : index
    %0 = vector.load %arg1[%c0, %c0_0] : memref<8x896xbf16, #tpu.memory_space<vmem>>, vector<8x896xbf16>
    %c0_1 = arith.constant 0 : index
    %c0_2 = arith.constant 0 : index
    %1 = vector.load %arg2[%c0_1, %c0_2] : memref<896x256xbf16, #tpu.memory_space<vmem>>, vector<896x256xbf16>
    %cst = arith.constant dense<0.000000e+00> : vector<8x256xf32>
    %2 = tpu.matmul %0, %1, %cst {dimension_numbers = #tpu.dot_dimension_numbers<[1], [0], [0], [1], [0, 0, 1, 1], [], []>} : vector<8x896xbf16>, vector<896x256xbf16>, vector<8x256xf32> -> vector<8x256xf32>
    %c0_3 = arith.constant 0 : index
    %c0_4 = arith.constant 0 : index
    %3 = vector.load %arg3[%c0_3, %c0_4] : memref<1x256xf32, #tpu.memory_space<vmem>>, vector<1x256xf32>
    %4 = vector.broadcast %3 : vector<1x256xf32> to vector<8x256xf32>
    %5 = arith.addf %2, %4 : vector<8x256xf32>
    %cst_5 = arith.constant 0.000000e+00 : f32
    %6 = vector.broadcast %cst_5 : f32 to vector<8x256xf32>
    %7 = arith.maximumf %5, %6 : vector<8x256xf32>
    %8 = arith.truncf %7 : vector<8x256xf32> to vector<8x256xbf16>
    %c0_6 = arith.constant 0 : index
    %c0_7 = arith.constant 0 : index
    %9 = vector.load %arg4[%c0_6, %c0_7] : memref<256x64xbf16, #tpu.memory_space<vmem>>, vector<256x64xbf16>
    %cst_8 = arith.constant dense<0.000000e+00> : vector<8x64xf32>
    %10 = tpu.matmul %8, %9, %cst_8 {dimension_numbers = #tpu.dot_dimension_numbers<[1], [0], [0], [1], [0, 0, 1, 1], [], []>} : vector<8x256xbf16>, vector<256x64xbf16>, vector<8x64xf32> -> vector<8x64xf32>
    %c0_9 = arith.constant 0 : index
    %c0_10 = arith.constant 0 : index
    %11 = vector.load %arg5[%c0_9, %c0_10] : memref<1x64xf32, #tpu.memory_space<vmem>>, vector<1x64xf32>
    %12 = vector.broadcast %11 : vector<1x64xf32> to vector<8x64xf32>
    %13 = arith.addf %10, %12 : vector<8x64xf32>
    %cst_11 = arith.constant 0.000000e+00 : f32
    %14 = vector.broadcast %cst_11 : f32 to vector<8x64xf32>
    %15 = arith.maximumf %13, %14 : vector<8x64xf32>
    %16 = arith.truncf %15 : vector<8x64xf32> to vector<8x64xbf16>
    %c0_12 = arith.constant 0 : index
    %c0_13 = arith.constant 0 : index
    %17 = vector.load %arg6[%c0_12, %c0_13] : memref<64x128xbf16, #tpu.memory_space<vmem>>, vector<64x128xbf16>
    %cst_14 = arith.constant dense<0.000000e+00> : vector<8x128xf32>
    %18 = tpu.matmul %16, %17, %cst_14 {dimension_numbers = #tpu.dot_dimension_numbers<[1], [0], [0], [1], [0, 0, 1, 1], [], []>} : vector<8x64xbf16>, vector<64x128xbf16>, vector<8x128xf32> -> vector<8x128xf32>
    %c0_15 = arith.constant 0 : index
    %c0_16 = arith.constant 0 : index
    %19 = vector.load %arg7[%c0_15, %c0_16] : memref<1x128xf32, #tpu.memory_space<vmem>>, vector<1x128xf32>
    %20 = vector.broadcast %19 : vector<1x128xf32> to vector<8x128xf32>
    %21 = arith.addf %18, %20 : vector<8x128xf32>
    %cst_17 = arith.constant 0.000000e+00 : f32
    %22 = vector.broadcast %cst_17 : f32 to vector<8x128xf32>
    %23 = arith.subf %22, %21 : vector<8x128xf32>
    %24 = math.exp %23 : vector<8x128xf32>
    %cst_18 = arith.constant 1.000000e+00 : f32
    %25 = vector.broadcast %cst_18 : f32 to vector<8x128xf32>
    %26 = arith.addf %25, %24 : vector<8x128xf32>
    %27 = tpu.reciprocal %26 {approx = true} : vector<8x128xf32> -> vector<8x128xf32>
    %c0_19 = arith.constant 0 : index
    %c0_20 = arith.constant 0 : index
    %28 = vector.load %arg8[%c0_19, %c0_20] : memref<8x128xf32, #tpu.memory_space<vmem>>, vector<8x128xf32>
    tpu.vector_store %arg8[%c0_19, %c0_20], %27 {strides = array<i32>} : memref<8x128xf32, #tpu.memory_space<vmem>>, vector<8x128xf32>,
    return
  }
  func.func @transform_0(%arg0: i32) -> (i32, i32) {
    %c0_i32 = arith.constant 0 : i32
    %c0_i32_0 = arith.constant 0 : i32
    return %arg0, %c0_i32 : i32, i32
  }
  func.func @transform_1(%arg0: i32) -> (i32, i32) {
    %c0_i32 = arith.constant 0 : i32
    %c0_i32_0 = arith.constant 0 : i32
    %c0_i32_1 = arith.constant 0 : i32
    return %c0_i32, %c0_i32_0 : i32, i32
  }
  func.func @transform_2(%arg0: i32) -> (i32, i32) {
    %c0_i32 = arith.constant 0 : i32
    %c0_i32_0 = arith.constant 0 : i32
    %c0_i32_1 = arith.constant 0 : i32
    return %c0_i32, %c0_i32_0 : i32, i32
  }
  func.func @transform_3(%arg0: i32) -> (i32, i32) {
    %c0_i32 = arith.constant 0 : i32
    %c0_i32_0 = arith.constant 0 : i32
    %c0_i32_1 = arith.constant 0 : i32
    return %c0_i32, %c0_i32_0 : i32, i32
  }
  func.func @transform_4(%arg0: i32) -> (i32, i32) {
    %c0_i32 = arith.constant 0 : i32
    %c0_i32_0 = arith.constant 0 : i32
    %c0_i32_1 = arith.constant 0 : i32
    return %c0_i32, %c0_i32_0 : i32, i32
  }
  func.func @transform_5(%arg0: i32) -> (i32, i32) {
    %c0_i32 = arith.constant 0 : i32
    %c0_i32_0 = arith.constant 0 : i32
    %c0_i32_1 = arith.constant 0 : i32
    return %c0_i32, %c0_i32_0 : i32, i32
  }
  func.func @transform_6(%arg0: i32) -> (i32, i32) {
    %c0_i32 = arith.constant 0 : i32
    %c0_i32_0 = arith.constant 0 : i32
    %c0_i32_1 = arith.constant 0 : i32
    return %c0_i32, %c0_i32_0 : i32, i32
  }
  func.func @transform_7(%arg0: i32) -> (i32, i32) {
    %c0_i32 = arith.constant 0 : i32
    %c0_i32_0 = arith.constant 0 : i32
    return %arg0, %c0_i32 : i32, i32
  }
}

</mosaic_0001>

<bundles_post_ra>
// kernel: tpu_custom_call.1
= control target key start
LH: loop header
LB: loop body
LE: loop exit
PB: predicated region body
PF: predicated region fallthrough
CT: control target
= control target key end

     0   :  { %12 = vsyncpa [#allocation3], 0  ;;  %s1813_s0 = inlined_call_operand.vmem [shape: bf16[8,896], index: 0, kind: input, shape index: {}]   ;;  %s1814_s1 = inlined_call_operand.hbm [shape: bf16[896,256], index: 1, kind: input, shape index: {}]   ;;  %s1815_s2 = inlined_call_operand.vmem [shape: f32[1,256], index: 2, kind: input, shape index: {}]   ;;  %s1816_s3 = inlined_call_operand.vmem [shape: bf16[256,64], index: 3, kind: input, shape index: {}]   ;;  %s1817_s4 = inlined_call_operand.vmem [shape: f32[1,64], index: 4, kind: input, shape index: {}]   ;;  %s1818_s5 = inlined_call_operand.vmem [shape: bf16[64,128], index: 5, kind: input, shape index: {}]   ;;  %s1819_s6 = inlined_call_operand.vmem [shape: f32[1,128], index: 6, kind: input, shape index: {}]   ;;  %s1820_s7 = inlined_call_operand.hbm [shape: f32[8,128], index: 7, kind: output, shape index: {}]  }
   0x1   :  { %13 = vsyncpa [#allocation4], 0  ;;  %s1649_s24 = smov [#allocation2]   ;;  %s1601_s28 = scalar_lea.hbm %s1814_s1, 14336 }
   0x2   :  { %s21_s25 = sshll.u32 %s1649_s24, 4  ;;  %p1602_p0 = scmp.ne.s32.totalorder %s1814_s1, %s1601_s28  ;;  %s22_s25 = int_to_ptr.vmem [resolvable:$true] %s21_s25 }
   0x3   :  { %p1605_p1 = scmp.lt.u32.totalorder %s1601_s28, %s1814_s1 }
   0x5   :  { %p1607_p2 = pnand %p1605_p1, %p1602_p0 }
   0x7   :  { %1610 = shalt.err (!%p1607_p2)
}
   0x8   :  { %s1611_s10 = scalar_lea.vmem %s22_s25, 14336  ;;  %p1616_p4 = scmp.lt.s32.totalorder %s22_s25, %s22_s25 }
   0x9   :  { %p1612_p3 = scmp.ne.s32.totalorder %s22_s25, %s1611_s10  ;;  %p1617_p5 = scmp.lt.s32.totalorder %s1611_s10, %s1611_s10 }
   0xb   :  { %p1618_p6 = por %p1617_p5, %p1616_p4 }
   0xd   :  { %p1619_p7 = pnand %p1618_p6, %p1612_p3 }
   0xf   :  { %1622 = shalt.err (!%p1619_p7)
}
  0x10   :  { %s1650_s11 = smov 128   ;;  %s1651_s12 = smov 8  }
  0x11   :  { %27 = dma.hbm_to_vmem [thread:$0]  %s1814_s1, 14336, %s22_s25, [#allocation3], %s1650_s11, %s1650_s11, %s1651_s12  }
  0x12   :  { %1645 = dma.done.wait [#allocation3], 14336  }
  0x13   :  { %1646 = vsyncadd [#allocation3], 4294952960  ;;  %v1402_v0 = vld [vmem:[#allocation2 + $0x104] ss:$8 sps:$4 sm:$0xff]   ;;  %v1404_v1 = vld [vmem:[#allocation2 + $0x100] ss:$8 sps:$4 sm:$0xff]  }
  0x14   :  { %796 = vmatprep.subr.bf16.mxu0 %v1402_v0  ;;  %v1405_v2 = vld [vmem:[#allocation2 + $0x114] ss:$8 sps:$4 sm:$0xff]   ;;  %v1407_v3 = vld [vmem:[#allocation2 + $0x110] ss:$8 sps:$4 sm:$0xff]   ;;  %v1408_v4 = vld [vmem:[#allocation2 + $0x124] ss:$8 sps:$4 sm:$0xff]  }
  0x15   :  { %797 = vmatpush1.bf16.msra.mxu0 %v1404_v1  ;;  %v1410_v5 = vld [vmem:[#allocation2 + $0x120] ss:$8 sps:$4 sm:$0xff]   ;;  %v1411_v6 = vld [vmem:[#allocation2 + $0x134] ss:$8 sps:$4 sm:$0xff]   ;;  %v1413_v7 = vld [vmem:[#allocation2 + $0x130] ss:$8 sps:$4 sm:$0xff]  }
  0x16   :  { %798 = vmatprep.subr.bf16.mxu0 %v1405_v2  ;;  %v1426_v8 = vld [vmem:[#allocation2 + $0x4] ss:$8 sps:$4 sm:$0xff]   ;;  %v1428_v9 = vld [vmem:[#allocation2] ss:$8 sps:$4 sm:$0xff]   ;;  %v1432_v11 = vld [vmem:[#allocation2 + $0x14] ss:$8 sps:$4 sm:$0xff]  }
  0x17   :  { %v1414_v10 = vld [vmem:[#allocation2 + $0x144] ss:$8 sps:$4 sm:$0xff]   ;;  %755 = vmatprep.subr.bf16.mxu1 %v1426_v8  ;;  %v1434_v12 = vld [vmem:[#allocation2 + $0x10] ss:$8 sps:$4 sm:$0xff]   ;;  %v1416_v13 = vld [vmem:[#allocation2 + $0x140] ss:$8 sps:$4 sm:$0xff]  }
  0x18   :  { %756 = vmatpush1.bf16.msra.mxu1 %v1428_v9  ;;  %v1417_v14 = vld [vmem:[#allocation2 + $0x154] ss:$8 sps:$4 sm:$0xff]   ;;  %v1438_v15 = vld [vmem:[#allocation2 + $0x24] ss:$8 sps:$4 sm:$0xff]   ;;  %v1440_v16 = vld [vmem:[#allocation2 + $0x20] ss:$8 sps:$4 sm:$0xff]  }
  0x19   :  { %799 = vmatpush1.bf16.msra.mxu0 %v1407_v3  ;;  %757 = vmatprep.subr.bf16.mxu1 %v1432_v11  ;;  %v1419_v17 = vld [vmem:[#allocation2 + $0x150] ss:$8 sps:$4 sm:$0xff]   ;;  %v1444_v18 = vld [vmem:[#allocation2 + $0x34] ss:$8 sps:$4 sm:$0xff]   ;;  %v1420_v19 = vld [vmem:[#allocation2 + $0x164] ss:$8 sps:$4 sm:$0xff]  }
  0x1a   :  { %800 = vmatprep.subr.bf16.mxu0 %v1408_v4  ;;  %v1446_v20 = vld [vmem:[#allocation2 + $0x30] ss:$8 sps:$4 sm:$0xff]   ;;  %v1422_v21 = vld [vmem:[#allocation2 + $0x160] ss:$8 sps:$4 sm:$0xff]   ;;  %v1450_v22 = vld [vmem:[#allocation2 + $0x44] ss:$8 sps:$4 sm:$0xff]  }
  0x1b   :  { %v1423_v23 = vld [vmem:[#allocation2 + $0x174] ss:$8 sps:$4 sm:$0xff]   ;;  %v1452_v24 = vld [vmem:[#allocation2 + $0x40] ss:$8 sps:$4 sm:$0xff]   ;;  %v1425_v25 = vld [vmem:[#allocation2 + $0x170] ss:$8 sps:$4 sm:$0xff]  }
  0x1c   :  { %758 = vmatpush1.bf16.msra.mxu1 %v1434_v12  ;;  %v1456_v26 = vld [vmem:[#allocation2 + $0x54] ss:$8 sps:$4 sm:$0xff]   ;;  %v1429_v27 = vld [vmem:[#allocation2 + $0x184] ss:$8 sps:$4 sm:$0xff]   ;;  %v1458_v28 = vld [vmem:[#allocation2 + $0x50] ss:$8 sps:$4 sm:$0xff]  }
  0x1d   :  { %801 = vmatpush1.bf16.msra.mxu0 %v1410_v5  ;;  %759 = vmatprep.subr.bf16.mxu1 %v1438_v15  ;;  %v1431_v29 = vld [vmem:[#allocation2 + $0x180] ss:$8 sps:$4 sm:$0xff]   ;;  %v1462_v30 = vld [vmem:[#allocation2 + $0x64] ss:$8 sps:$4 sm:$0xff]   ;;  %v1435_v31 = vld [vmem:[#allocation2 + $0x194] ss:$8 sps:$4 sm:$0xff]  }
  0x1e   :  { %802 = vmatprep.subr.bf16.mxu0 %v1411_v6  ;;  %v1711_v32 = vld [vmem:[%s1813_s0 + $0x8] sm:$0xff]  ;;  %v1437_v33 = vld [vmem:[#allocation2 + $0x190] ss:$8 sps:$4 sm:$0xff]   ;;  %v1468_v36 = vld [vmem:[#allocation2 + $0x74] ss:$8 sps:$4 sm:$0xff]   ;;  %vm1654_vm0 = vmmov 0  }
  0x1f   :  { %v1464_v34 = vld [vmem:[#allocation2 + $0x60] ss:$8 sps:$4 sm:$0xff]   ;;  %v1207_v35 = vcombine.high %v1711_v32, %v1711_v32  ;;  %v1441_v37 = vld [vmem:[#allocation2 + $0x1a4] ss:$8 sps:$4 sm:$0xff]   ;;  %v1470_v39 = vld [vmem:[#allocation2 + $0x70] ss:$8 sps:$4 sm:$0xff]   ;;  %v1206_v1 = vcombine.low %v1711_v32, %v1711_v32 }
  0x20   :  { %760 = vmatpush1.bf16.msra.mxu1 %v1440_v16  ;;  %v1443_v38 = vld [vmem:[#allocation2 + $0x1a0] ss:$8 sps:$4 sm:$0xff]   ;;  %v1474_v40 = vld [vmem:[#allocation2 + $0x84] ss:$8 sps:$4 sm:$0xff]   ;;  %v1447_v41 = vld [vmem:[#allocation2 + $0x1b4] ss:$8 sps:$4 sm:$0xff]  }
  0x21   :  { %803 = vmatpush1.bf16.msra.mxu0 %v1413_v7  ;;  %761 = vmatprep.subr.bf16.mxu1 %v1444_v18  ;;  %v1449_v42 = vld [vmem:[#allocation2 + $0x1b0] ss:$8 sps:$4 sm:$0xff]   ;;  %v1476_v43 = vld [vmem:[#allocation2 + $0x80] ss:$8 sps:$4 sm:$0xff]   ;;  %v1482_v44 = vld [vmem:[#allocation2 + $0x94] ss:$8 sps:$4 sm:$0xff]  }
  0x22   :  { %804 = vmatprep.subr.bf16.mxu0 %v1414_v10  ;;  %828 = vmatprep.mubr.bf16.mxu0 %v1207_v35  ;;  %v1453_v45 = vld [vmem:[#allocation2 + $0x1c4] ss:$8 sps:$4 sm:$0xff]   ;;  %v1455_v46 = vld [vmem:[#allocation2 + $0x1c0] ss:$8 sps:$4 sm:$0xff]   ;;  %v1484_v47 = vld [vmem:[#allocation2 + $0x90] ss:$8 sps:$4 sm:$0xff]  }
  0x23   :  { %v1488_v48 = vld [vmem:[#allocation2 + $0xa4] ss:$8 sps:$4 sm:$0xff]   ;;  %v1459_v49 = vld [vmem:[#allocation2 + $0x1d4] ss:$8 sps:$4 sm:$0xff]   ;;  %v1461_v50 = vld [vmem:[#allocation2 + $0x1d0] ss:$8 sps:$4 sm:$0xff]  }
  0x24   :  { %762 = vmatpush1.bf16.msra.mxu1 %v1446_v20  ;;  %v1490_v51 = vld [vmem:[#allocation2 + $0xa0] ss:$8 sps:$4 sm:$0xff]   ;;  %v1494_v52 = vld [vmem:[#allocation2 + $0xb4] ss:$8 sps:$4 sm:$0xff]   ;;  %v1465_v53 = vld [vmem:[#allocation2 + $0x1e4] ss:$8 sps:$4 sm:$0xff]  }
  0x25   :  { %805 = vmatpush1.bf16.msra.mxu0 %v1416_v13  ;;  %763 = vmatprep.subr.bf16.mxu1 %v1450_v22  ;;  %v1467_v54 = vld [vmem:[#allocation2 + $0x1e0] ss:$8 sps:$4 sm:$0xff]   ;;  %v1496_v56 = vld [vmem:[#allocation2 + $0xb0] ss:$8 sps:$4 sm:$0xff]   ;;  %v1500_v58 = vld [vmem:[#allocation2 + $0xc4] ss:$8 sps:$4 sm:$0xff]  }
  0x26   :  { %806 = vmatprep.subr.bf16.mxu0 %v1417_v14  ;;  %v42_v55 = vld [vmem:[%s1813_s0] sm:$0xff]  ;;  %v1471_v59 = vld [vmem:[#allocation2 + $0x1f4] ss:$8 sps:$4 sm:$0xff]   ;;  %v1473_v60 = vld [vmem:[#allocation2 + $0x1f0] ss:$8 sps:$4 sm:$0xff]   ;;  %vm1139_vm1 = vcmask 523264  }
  0x27   :  { %v1205_v57 = vcombine.high %v42_v55, %v42_v55  ;;  %v1502_v61 = vld [vmem:[#allocation2 + $0xc0] ss:$8 sps:$4 sm:$0xff]   ;;  %v1506_v62 = vld [vmem:[#allocation2 + $0xd4] ss:$8 sps:$4 sm:$0xff]   ;;  %v1481_v63 = vld [vmem:[#allocation2 + $0x204] ss:$8 sps:$4 sm:$0xff]   ;;  %v1204_v14 = vcombine.low %v42_v55, %v42_v55 }
  0x28   :  { %764 = vmatpush1.bf16.msra.mxu1 %v1452_v24  ;;  %v1479_v0 = vld [vmem:[#allocation2 + $0x200] ss:$8 sps:$4 sm:$0xff]   ;;  %v1508_v2 = vld [vmem:[#allocation2 + $0xd0] ss:$8 sps:$4 sm:$0xff]   ;;  %v1512_v3 = vld [vmem:[#allocation2 + $0xe4] ss:$8 sps:$4 sm:$0xff]  }
  0x29   :  { %807 = vmatpush1.bf16.msra.mxu0 %v1419_v17  ;;  %765 = vmatprep.subr.bf16.mxu1 %v1456_v26  ;;  %v1487_v4 = vld [vmem:[#allocation2 + $0x214] ss:$8 sps:$4 sm:$0xff]   ;;  %v1485_v5 = vld [vmem:[#allocation2 + $0x210] ss:$8 sps:$4 sm:$0xff]   ;;  %v1514_v6 = vld [vmem:[#allocation2 + $0xe0] ss:$8 sps:$4 sm:$0xff]  }
  0x2a   :  { %808 = vmatprep.subr.bf16.mxu0 %v1420_v19  ;;  %787 = vmatprep.mubr.bf16.mxu1 %v1205_v57  ;;  %v1518_v7 = vld [vmem:[#allocation2 + $0xf4] ss:$8 sps:$4 sm:$0xff]   ;;  %v1493_v8 = vld [vmem:[#allocation2 + $0x224] ss:$8 sps:$4 sm:$0xff]   ;;  %v1491_v9 = vld [vmem:[#allocation2 + $0x220] ss:$8 sps:$4 sm:$0xff]  }
  0x2b   :  { %v1520_v10 = vld [vmem:[#allocation2 + $0xf0] ss:$8 sps:$4 sm:$0xff]   ;;  %v1528_v11 = vld [vmem:[#allocation2 + $0x304] ss:$8 sps:$4 sm:$0xff]   ;;  %v1499_v12 = vld [vmem:[#allocation2 + $0x234] ss:$8 sps:$4 sm:$0xff]  }
  0x2c   :  { %766 = vmatpush1.bf16.msra.mxu1 %v1458_v28  ;;  %v1497_v13 = vld [vmem:[#allocation2 + $0x230] ss:$8 sps:$4 sm:$0xff]   ;;  %v1526_v15 = vld [vmem:[#allocation2 + $0x300] ss:$8 sps:$4 sm:$0xff]   ;;  %v1534_v16 = vld [vmem:[#allocation2 + $0x314] ss:$8 sps:$4 sm:$0xff]  }
  0x2d   :  { %809 = vmatpush1.bf16.msra.mxu0 %v1422_v21  ;;  %767 = vmatprep.subr.bf16.mxu1 %v1462_v30  ;;  %v1723_v17 = vld [vmem:[%s1813_s0 + $0x10] sm:$0xff]  ;;  %v1505_v18 = vld [vmem:[#allocation2 + $0x244] ss:$8 sps:$4 sm:$0xff]   ;;  %v1503_v21 = vld [vmem:[#allocation2 + $0x240] ss:$8 sps:$4 sm:$0xff]   ;;  %v1652_v24 = vmov 0  }
  0x2e   :  { %810 = vmatprep.subr.bf16.mxu0 %v1423_v23  ;;  %v1532_v19 = vld [vmem:[#allocation2 + $0x310] ss:$8 sps:$4 sm:$0xff]   ;;  %v1209_v20 = vcombine.high %v1723_v17, %v1723_v17  ;;  %v1540_v22 = vld [vmem:[#allocation2 + $0x324] ss:$8 sps:$4 sm:$0xff]   ;;  %v1511_v23 = vld [vmem:[#allocation2 + $0x254] ss:$8 sps:$4 sm:$0xff]  }
  0x2f   :  { %v1509_v26 = vld [vmem:[#allocation2 + $0x250] ss:$8 sps:$4 sm:$0xff]   ;;  %v1517_v28 = vld [vmem:[#allocation2 + $0x264] ss:$8 sps:$4 sm:$0xff]   ;;  %v1515_v30 = vld [vmem:[#allocation2 + $0x260] ss:$8 sps:$4 sm:$0xff]  }
  0x30   :  { %768 = vmatpush1.bf16.msra.mxu1 %v1464_v34  ;;  %v1523_v32 = vld [vmem:[#allocation2 + $0x274] ss:$8 sps:$4 sm:$0xff]   ;;  %v1521_v34 = vld [vmem:[#allocation2 + $0x270] ss:$8 sps:$4 sm:$0xff]   ;;  %v1565_v55 = vld [vmem:[#allocation2 + $0x2e0] ss:$8 sps:$4 sm:$0xff]  }
  0x31   :  { %811 = vmatpush1.bf16.msra.mxu0 %v1425_v25  ;;  %769 = vmatprep.subr.bf16.mxu1 %v1468_v36  ;;  %v1538_v25 = vld [vmem:[#allocation2 + $0x320] ss:$8 sps:$4 sm:$0xff]   ;;  %v1558_v35 = vld [vmem:[#allocation2 + $0x354] ss:$8 sps:$4 sm:$0xff]   ;;  %v1531_v36 = vld [vmem:[#allocation2 + $0x284] ss:$8 sps:$4 sm:$0xff]  }
  0x32   :  { %812 = vmatprep.subr.bf16.mxu0 %v1429_v27  ;;  %v1546_v27 = vld [vmem:[#allocation2 + $0x334] ss:$8 sps:$4 sm:$0xff]   ;;  %v1571_v57 = vld [vmem:[#allocation2 + $0x2f0] ss:$8 sps:$4 sm:$0xff]  }
  0x34   :  { %770 = vmatpush1.bf16.msra.mxu1 %v1470_v39  ;;  %v1564_v39 = vld [vmem:[#allocation2 + $0x364] ss:$8 sps:$4 sm:$0xff]  }
  0x35   :  { %813 = vmatpush1.bf16.msra.mxu0 %v1431_v29  ;;  %771 = vmatprep.subr.bf16.mxu1 %v1474_v40  ;;  %v1544_v29 = vld [vmem:[#allocation2 + $0x330] ss:$8 sps:$4 sm:$0xff]   ;;  %v1537_v40 = vld [vmem:[#allocation2 + $0x294] ss:$8 sps:$4 sm:$0xff]  }
  0x36   :  { %814 = vmatprep.subr.bf16.mxu0 %v1435_v31  ;;  %v1552_v31 = vld [vmem:[#allocation2 + $0x344] ss:$8 sps:$4 sm:$0xff]  }
  0x38   :  { %772 = vmatpush1.bf16.msra.mxu1 %v1476_v43  ;;  %v1570_v43 = vld [vmem:[#allocation2 + $0x374] ss:$8 sps:$4 sm:$0xff]  }
  0x39   :  { %815 = vmatpush1.bf16.msra.mxu0 %v1437_v33  ;;  %773 = vmatprep.subr.bf16.mxu1 %v1482_v44  ;;  %v1550_v33 = vld [vmem:[#allocation2 + $0x340] ss:$8 sps:$4 sm:$0xff]   ;;  %v1543_v44 = vld [vmem:[#allocation2 + $0x2a4] ss:$8 sps:$4 sm:$0xff]  }
  0x3a   :  { %816 = vmatprep.subr.bf16.mxu0 %v1441_v37  ;;  %v1556_v37 = vld [vmem:[#allocation2 + $0x350] ss:$8 sps:$4 sm:$0xff]  }
  0x3c   :  { %774 = vmatpush1.bf16.msra.mxu1 %v1484_v47  ;;  %v1549_v47 = vld [vmem:[#allocation2 + $0x2b4] ss:$8 sps:$4 sm:$0xff]  }
  0x3d   :  { %817 = vmatpush1.bf16.msra.mxu0 %v1443_v38  ;;  %775 = vmatprep.subr.bf16.mxu1 %v1488_v48  ;;  %v1529_v38 = vld [vmem:[#allocation2 + $0x280] ss:$8 sps:$4 sm:$0xff]   ;;  %v1576_v48 = vld [vmem:[%s1813_s0 + $0x18] ss:$0 sps:$4 sm:$0xff]  }
  0x3e   :  { %818 = vmatprep.subr.bf16.mxu0 %v1447_v41  ;;  %v1562_v41 = vld [vmem:[#allocation2 + $0x360] ss:$8 sps:$4 sm:$0xff]  }
  0x40   :  { %776 = vmatpush1.bf16.msra.mxu1 %v1490_v51  ;;  %v1553_v51 = vld [vmem:[#allocation2 + $0x2c0] ss:$8 sps:$4 sm:$0xff]  }
  0x41   :  { %819 = vmatpush1.bf16.msra.mxu0 %v1449_v42  ;;  %777 = vmatprep.subr.bf16.mxu1 %v1494_v52  ;;  %v1535_v42 = vld [vmem:[#allocation2 + $0x290] ss:$8 sps:$4 sm:$0xff]   ;;  %v1561_v52 = vld [vmem:[#allocation2 + $0x2d4] ss:$8 sps:$4 sm:$0xff]  }
  0x42   :  { %820 = vmatprep.subr.bf16.mxu0 %v1453_v45  ;;  %v1568_v45 = vld [vmem:[#allocation2 + $0x370] ss:$8 sps:$4 sm:$0xff]  }
  0x44   :  { %778 = vmatpush1.bf16.msra.mxu1 %v1496_v56  ;;  %v1573_v56 = vld [vmem:[#allocation2 + $0x2f4] ss:$8 sps:$4 sm:$0xff]  }
  0x45   :  { %821 = vmatpush1.bf16.msra.mxu0 %v1455_v46  ;;  %779 = vmatprep.subr.bf16.mxu1 %v1500_v58  ;;  %v1541_v46 = vld [vmem:[#allocation2 + $0x2a0] ss:$8 sps:$4 sm:$0xff]   ;;  %v1208_v58 = vcombine.low %v1723_v17, %v1723_v17 }
  0x46   :  { %822 = vmatprep.subr.bf16.mxu0 %v1459_v49  ;;  %v1547_v49 = vld [vmem:[#allocation2 + $0x2b0] ss:$8 sps:$4 sm:$0xff]  }
  0x48   :  { %780 = vmatpush1.bf16.msra.mxu1 %v1502_v61  ;;  %v1579_v61 = vld [vmem:[%s1816_s3 + $0x48] sm:$0xff]  }
  0x49   :  { %823 = vmatpush1.bf16.msra.mxu0 %v1461_v50  ;;  %781 = vmatprep.subr.bf16.mxu1 %v1506_v62  ;;  %v1555_v50 = vld [vmem:[#allocation2 + $0x2c4] ss:$8 sps:$4 sm:$0xff]  }
  0x4a   :  { %824 = vmatprep.subr.bf16.mxu0 %v1465_v53  ;;  %v1559_v53 = vld [vmem:[#allocation2 + $0x2d0] ss:$8 sps:$4 sm:$0xff]   ;;  %v1580_v62 = vld [vmem:[%s1816_s3 + $0x8] sm:$0xff]  }
  0x4c   :  { %782 = vmatpush1.bf16.msra.mxu1 %v1508_v2  ;;  %v1584_v2 = vld [vmem:[%s1816_s3 + $0x18] sm:$0xff]  }
  0x4d   :  { %825 = vmatpush1.bf16.msra.mxu0 %v1467_v54  ;;  %783 = vmatprep.subr.bf16.mxu1 %v1512_v3  ;;  %v1567_v54 = vld [vmem:[#allocation2 + $0x2e4] ss:$8 sps:$4 sm:$0xff]  }
  0x4e   :  { %826 = vmatprep.subr.bf16.mxu0 %v1471_v59  ;;  %v1577_v59 = vld [vmem:[%s1816_s3 + $0x40] sm:$0xff]  }
  0x4f   :  { %v1585_v3 = vld [vmem:[%s1816_s3 + $0x60] sm:$0xff]  }
  0x50   :  { %784 = vmatpush1.bf16.msra.mxu1 %v1514_v6  ;;  %v1588_v6 = vld [vmem:[%s1816_s3 + $0x28] sm:$0xff]  }
  0x51   :  { %827 = vmatpush1.bf16.msra.mxu0 %v1473_v60  ;;  %785 = vmatprep.subr.bf16.mxu1 %v1518_v7  ;;  %v1578_v60 = vld [vmem:[%s1816_s3] sm:$0xff]   ;;  %v1589_v7 = vld [vmem:[%s1816_s3 + $0x70] sm:$0xff]  }
  0x52   :  { %837 = vmatprep.subr.bf16.mxu0 %v1481_v63  ;;  %v1581_v63 = vld [vmem:[%s1816_s3 + $0x50] sm:$0xff]  }
  0x54   :  { %829 = vmatmul.mubr.bf16.vlgmr.msra.gmra.mrb[0].mxu0 %v1206_v1  ;;  %786 = vmatpush1.bf16.msra.mxu1 %v1520_v10  ;;  %v1583_v1 = vld [vmem:[%s1816_s3 + $0x58] sm:$0xff]  }
  0x55   :  { %838 = vmatpush1.bf16.msra.mxu0 %v1479_v0  ;;  %878 = vmatprep.subr.bf16.mxu1 %v1528_v11  ;;  %v1582_v0 = vld [vmem:[%s1816_s3 + $0x10] sm:$0xff]   ;;  %v1592_v10 = vld [vmem:[%s1816_s3 + $0x38] sm:$0xff]   ;;  %v1653_v11 = vmov 0.0  }
  0x56   :  { %839 = vmatprep.subr.bf16.mxu0 %v1487_v4  ;;  %869 = vmatprep.mubr.bf16.mxu0 %v1209_v20  ;;  %v1586_v4 = vld [vmem:[%s1816_s3 + $0x20] sm:$0xff]   ;;  %v160_v20 = vlaneseq }
  0x57   :  { %788 = vmatmul.mubr.bf16.vlgmr.msra.gmra.mrb[0].mxu1 %v1204_v14 }
  0x58   :  { %879 = vmatpush1.bf16.msra.mxu1 %v1526_v15  ;;  %910 = vmatprep.mubr.bf16.mxu1 %v1652_v24 }
  0x59   :  { %840 = vmatpush1.bf16.msra.mxu0 %v1485_v5  ;;  %880 = vmatprep.subr.bf16.mxu1 %v1534_v16  ;;  %v1587_v5 = vld [vmem:[%s1816_s3 + $0x68] sm:$0xff]  }
  0x5a   :  { %841 = vmatprep.subr.bf16.mxu0 %v1493_v8  ;;  %v1590_v8 = vld [vmem:[%s1816_s3 + $0x30] sm:$0xff]  }
  0x5c   :  { %881 = vmatpush1.bf16.msra.mxu1 %v1532_v19 }
  0x5d   :  { %842 = vmatpush1.bf16.msra.mxu0 %v1491_v9  ;;  %882 = vmatprep.subr.bf16.mxu1 %v1540_v22  ;;  %v1591_v9 = vld [vmem:[%s1816_s3 + $0x78] sm:$0xff]  }
  0x5e   :  { %843 = vmatprep.subr.bf16.mxu0 %v1499_v12 }
  0x60   :  { %883 = vmatpush1.bf16.msra.mxu1 %v1538_v25 }
  0x61   :  { %844 = vmatpush1.bf16.msra.mxu0 %v1497_v13  ;;  %884 = vmatprep.subr.bf16.mxu1 %v1546_v27 }
  0x62   :  { %845 = vmatprep.subr.bf16.mxu0 %v1505_v18 }
  0x64   :  { %885 = vmatpush1.bf16.msra.mxu1 %v1544_v29 }
  0x65   :  { %846 = vmatpush1.bf16.msra.mxu0 %v1503_v21  ;;  %886 = vmatprep.subr.bf16.mxu1 %v1552_v31  ;;  %v161_v21 = vshrl.u32 %v160_v20, 7 }
  0x66   :  { %847 = vmatprep.subr.bf16.mxu0 %v1511_v23  ;;  %v158_v23 = vld [vmem:[%s1815_s2] sm:$0x3] }
  0x67   :  { %v162_v22 = vsub.s32 0, %v161_v21  ;;  %v166_v24 = vsub.s32 1, %v161_v21 }
  0x68   :  { %887 = vmatpush1.bf16.msra.mxu1 %v1550_v33 }
  0x69   :  { %848 = vmatpush1.bf16.msra.mxu0 %v1509_v26  ;;  %888 = vmatprep.subr.bf16.mxu1 %v1558_v35  ;;  %v163_v25 = vrot.slane %v158_v23, %v162_v22  ;;  %v167_v26 = vrot.slane %v158_v23, %v166_v24 }
  0x6a   :  { %849 = vmatprep.subr.bf16.mxu0 %v1517_v28 }
  0x6c   :  { %889 = vmatpush1.bf16.msra.mxu1 %v1556_v37 }
  0x6d   :  { %850 = vmatpush1.bf16.msra.mxu0 %v1515_v30  ;;  %890 = vmatprep.subr.bf16.mxu1 %v1564_v39 }
  0x6e   :  { %851 = vmatprep.subr.bf16.mxu0 %v1523_v32 }
  0x70   :  { %891 = vmatpush1.bf16.msra.mxu1 %v1562_v41 }
  0x71   :  { %852 = vmatpush1.bf16.msra.mxu0 %v1521_v34  ;;  %892 = vmatprep.subr.bf16.mxu1 %v1570_v43  ;;  %v1595_v43 = vld [vmem:[%s1818_s5 + $0x10] sm:$0xff]  }
  0x72   :  { %853 = vmatprep.subr.bf16.mxu0 %v1531_v36 }
  0x74   :  { %893 = vmatpush1.bf16.msra.mxu1 %v1568_v45 }
  0x75   :  { %854 = vmatpush1.bf16.msra.mxu0 %v1529_v38  ;;  %1346 = vmatprep.subr.bf16.mxu1 %v1577_v59 }
  0x76   :  { %855 = vmatprep.subr.bf16.mxu0 %v1537_v40  ;;  %v1593_v40 = vld [vmem:[%s1818_s5] sm:$0xff]  }
  0x77   :  { %911 = vmatmul.mubr.bf16.vlgmr.msra.gmra.mrb[4].mxu1 %v1576_v48 }
  0x78   :  { %1347 = vmatpush3.bf16.msra.mxu1 %v1578_v60 }
  0x79   :  { %856 = vmatpush1.bf16.msra.mxu0 %v1535_v42  ;;  %1348 = vmatprep.subr.bf16.mxu1 %v1579_v61  ;;  %v1594_v42 = vld [vmem:[%s1818_s5 + $0x8] sm:$0xff]  }
  0x7a   :  { %857 = vmatprep.subr.bf16.mxu0 %v1543_v44  ;;  %v1596_v44 = vld [vmem:[%s1818_s5 + $0x18] sm:$0xff]  }
  0x7c   :  { %1349 = vmatpush3.bf16.msra.mxu1 %v1580_v62 }
  0x7d   :  { %858 = vmatpush1.bf16.msra.mxu0 %v1541_v46  ;;  %1350 = vmatprep.subr.bf16.mxu1 %v1581_v63  ;;  %v1323_v46 = vld [vmem:[%s1817_s4] ss:$0 sm:$0xff]  ;;  %s1655_s4 = smov [#allocation5]  }
  0x7e   :  { %859 = vmatprep.subr.bf16.mxu0 %v1549_v47  ;;  %s1195_s5 = sshll.u32 %s1655_s4, 4  ;;  %s1196_s5 = int_to_ptr.vmem [resolvable:$true] %s1195_s5 }
  0x7f   :  { %s1623_s16 = scalar_lea.vmem %s1196_s5, 128  ;;  %p1628_p9 = scmp.lt.s32.totalorder %s1196_s5, %s1196_s5 }
  0x80   :  { %1351 = vmatpush3.bf16.msra.mxu1 %v1582_v0  ;;  %p1624_p8 = scmp.ne.s32.totalorder %s1196_s5, %s1623_s16  ;;  %p1629_p10 = scmp.lt.s32.totalorder %s1623_s16, %s1623_s16 }
  0x81   :  { %860 = vmatpush1.bf16.msra.mxu0 %v1547_v49  ;;  %1352 = vmatprep.subr.bf16.mxu1 %v1583_v1 }
  0x82   :  { %861 = vmatprep.subr.bf16.mxu0 %v1555_v50  ;;  %p1630_p11 = por %p1629_p10, %p1628_p9 }
  0x84   :  { %1353 = vmatpush3.bf16.msra.mxu1 %v1584_v2  ;;  %p1631_p12 = pnand %p1630_p11, %p1624_p8 }
  0x85   :  { %862 = vmatpush1.bf16.msra.mxu0 %v1553_v51  ;;  %1354 = vmatprep.subr.bf16.mxu1 %v1585_v3 }
  0x86   :  { %863 = vmatprep.subr.bf16.mxu0 %v1561_v52 }
  0x88   :  { %1355 = vmatpush3.bf16.msra.mxu1 %v1586_v4 }
  0x89   :  { %864 = vmatpush1.bf16.msra.mxu0 %v1559_v53  ;;  %1356 = vmatprep.subr.bf16.mxu1 %v1587_v5 }
  0x8a   :  { %865 = vmatprep.subr.bf16.mxu0 %v1567_v54  ;;  %v1340_v54 = vld [vmem:[%s1819_s6] ss:$0 sm:$0xff] }
  0x8c   :  { %1357 = vmatpush3.bf16.msra.mxu1 %v1588_v6 }
  0x8d   :  { %866 = vmatpush1.bf16.msra.mxu0 %v1565_v55  ;;  %1358 = vmatprep.subr.bf16.mxu1 %v1589_v7 }
  0x8e   :  { %867 = vmatprep.subr.bf16.mxu0 %v1573_v56 }
  0x90   :  { %1359 = vmatpush3.bf16.msra.mxu1 %v1590_v8 }
  0x91   :  { %868 = vmatpush1.bf16.msra.mxu0 %v1571_v57  ;;  %1360 = vmatprep.subr.bf16.mxu1 %v1591_v9 }
  0x94   :  { %870 = vmatmul.mubr.bf16.vlgmr.msra.gmra.mrb[0].mxu0 %v1208_v58  ;;  %1361 = vmatpush3.bf16.msra.mxu1 %v1592_v10 }
  0x95   :  { %1373 = vmatprep.subr.bf16.mxu1 %v1653_v11 }
 0x12a   :  { %v789_v12 = vpop.f32.mrb[0].mxu1 }
 0x12b   :  { %v791_v13 = vpop.f32.mrb[1].mxu1  ;;  %v790_v27 = vadd.f32 %v789_v12, %v163_v25 }
 0x12c   :  { %v793_v14 = vpop.f32.mrb[2].mxu1  ;;  %v792_v28 = vadd.f32 %v791_v13, %v167_v26 }
 0x12d   :  { %v794_v15 = vpop.f32.mrb[3].mxu1 }
 0x14a   :  { %v912_v16 = vpop.f32.mrb[4].mxu1 }
 0x14b   :  { %v914_v17 = vpop.f32.mrb[5].mxu1 }
 0x14c   :  { %v916_v18 = vpop.f32.mrb[6].mxu1 }
 0x14d   :  { %v917_v19 = vpop.f32.mrb[7].mxu1 }
 0x167   :  { %v871_v29 = vpop.f32.mrb[0].mxu0 }
 0x168   :  { %v1386_v30 = vadd.f32 %v871_v29, %v790_v27  ;;  %v873_v31 = vpop.f32.mrb[1].mxu0 }
 0x169   :  { %v1389_v32 = vadd.f32 %v873_v31, %v792_v28  ;;  %v875_v33 = vpop.f32.mrb[2].mxu0 }
 0x16a   :  { %v1387_v34 = vadd.f32 %v1386_v30, %v912_v16  ;;  %v876_v35 = vpop.f32.mrb[3].mxu0 }
 0x16b   :  { %v1390_v36 = vadd.f32 %v1389_v32, %v914_v17 }
 0x16c   :  { %v919_v37 = vmax.f32 %v1387_v34, 0.0 }
 0x16d   :  { %v920_v38 = vmax.f32 %v1390_v36, 0.0 }
 0x16e   :  { %v921_v41 = vpack.c.bf16 %v919_v37, %v919_v37 }
 0x16f   :  { %v922_v39 = vpack.c.bf16 %v920_v38, %v920_v38 }
 0x171   :  { %1090 = vmatprep.mubr.bf16.mxu1 %v922_v39 }
 0x172   :  { %1091 = vmatmul.mubr.bf16.vlgmr.msra.gmra.mrb[8].mxu1 %v921_v41 }
 0x173   :  { %1374 = vmatpush3.bf16.msra.mxu1 %v1593_v40  ;;  %1381 = vmatprep.mubr.msk.bf16.mxu1 %vm1654_vm0, %v1653_v11 }
 0x174   :  { %1375 = vmatprep.subr.bf16.mxu1 %v1653_v11 }
 0x177   :  { %1376 = vmatpush3.bf16.msra.mxu1 %v1594_v42 }
 0x178   :  { %1377 = vmatprep.subr.bf16.mxu1 %v1653_v11 }
 0x17b   :  { %1378 = vmatpush3.bf16.msra.mxu1 %v1595_v43 }
 0x17c   :  { %1379 = vmatprep.subr.bf16.mxu1 %v1653_v11 }
 0x17f   :  { %1380 = vmatpush3.bf16.msra.mxu1 %v1596_v44 }
 0x245   :  { %v1362_v45 = vpop.f32.mrb[8].mxu1 }
 0x246   :  { %v1363_v47 = vpop.f32.mrb[9].mxu1 }
 0x247   :  { %v1364_v48 = vadd.f32 %v1363_v47, %v1362_v45  ;;  %v1365_v49 = vpop.f32.mrb[10].mxu1 }
 0x248   :  { %v1366_v50 = vpop.f32.mrb[11].mxu1 }
 0x249   :  { %v1093_v51 = vadd.f32 %v1364_v48, %v1323_v46 }
 0x24b   :  { %v1098_v52 = vmax.f32 %v1093_v51, 0.0 }
 0x24d   :  { %v1099_v53 = vpack.c.bf16 %v1098_v52, %v1098_v52 }
 0x24f   :  { %1382 = vmatmul.mubr.msk.bf16.vlgmr.msra.gmra.mrb[12].mxu1 %vm1139_vm1, %v1099_v53 }
 0x322   :  { %v1177_v55 = vpop.f32.mrb[12].mxu1 }
 0x323   :  { %v1178_v56 = vadd.f32 %v1340_v54, %v1177_v55  ;;  %v1383_v57 = vpop.f32.mrb[13].mxu1 }
 0x324   :  { %v1180_v58 = vpop.f32.mrb[14].mxu1 }
 0x325   :  { %v1183_v59 = vsub.f32 0.0, %v1178_v56  ;;  %v1384_v60 = vpop.f32.mrb[15].mxu1 }
 0x327   :  { %v1184_v61 = vmul.f32 1.442695, %v1183_v59 }
 0x329   :  { %1597 = vpow2.f32 %v1184_v61 }
 0x333   :  { %v1598_v62 = vpop.eup %1597 }
 0x334   :  { %v1186_v63 = vadd.f32 1.0, %v1598_v62 }
 0x336   :  { %1599 = vrcp.f32 %v1186_v63 }
 0x340   :  { %v1600_v0 = vpop.eup %1599 }
 0x341   :  { %1188 = vst [vmem:[#allocation5] sm:$0xff] %v1600_v0 }
 0x342   :  { %1634 = shalt.err (!%p1631_p12)
}
 0x343   :  { %s1635_s18 = scalar_lea.hbm %s1820_s7, 128 }
 0x344   :  { %p1636_p13 = scmp.ne.s32.totalorder %s1820_s7, %s1635_s18  ;;  %p1639_p0 = scmp.lt.u32.totalorder %s1635_s18, %s1820_s7 }
 0x346   :  { %p1641_p1 = pnand %p1639_p0, %p1636_p13 }
 0x348   :  { %1644 = shalt.err (!%p1641_p1)
}
 0x349   :  { %1198 = dma.vmem_to_hbm [thread:$0]  %s1196_s5, 128, %s1820_s7, [#allocation4]  }
 0x34a   :  { %1647 = dma.done.wait [#allocation4], 128  }
 0x34b   :  { %1648 = vsyncadd [#allocation4], 4294967168 }
 0x34c   :  { %1202 = vsyncpa [#allocation3], 1 }
 0x34d   :  { %1203 = vsyncpa [#allocation4], 1 }

</bundles_post_ra>
